<compile_context>
chip_gen: v7x
topology: tpu7x:2x2x1
jax: 0.10.0
libtpu: 0.0.40
codegen_flags: <defaults>
</compile_context>

<pallas_src>
import functools

import jax
import jax.numpy as jnp
from jax.experimental import pallas as pl
from jax.experimental.pallas import tpu as pltpu


def _round_up(x, m):
    return ((x + m - 1) // m) * m


def _largest_divisor_leq(n, cap):
    cap = max(1, min(n, cap))
    for c in range(cap, 0, -1):
        if n % c == 0:
            return c
    return 1


def _pick_tile(dim, granule, cap):
    """Tile size for `dim`: multiple of `granule`, <= cap.  Prefers a divisor of the
    granule-rounded dim (no padding); falls back to a padded cap-sized tile only when
    the best divisor would be tiny (avoids re-streaming the other operand)."""
    dim_p = _round_up(dim, granule)
    units = dim_p // granule
    cap_units = max(1, cap // granule)
    best = _largest_divisor_leq(units, cap_units)
    if best == units or best * granule * 2 >= cap:
        return best * granule
    return min(cap, dim_p)


# --------------------------- Tiled matmul + bias kernel ---------------------------
# out = x @ w_t + bias.  Used for the hoisted LSTM input projection and the decoder.

def _matmul_bias_kernel(x_ref, w_ref, b_ref, o_ref, acc_ref):
    k = pl.program_id(2)

    @pl.when(k == 0)
    def _():
        acc_ref[...] = jnp.zeros_like(acc_ref)

    acc_ref[...] += jnp.dot(x_ref[...], w_ref[...],
                            preferred_element_type=jnp.float32)

    @pl.when(k == pl.num_programs(2) - 1)
    def _():
        o_ref[...] = (acc_ref[...] + b_ref[...].astype(jnp.float32)).astype(o_ref.dtype)


def matmul_bias(x, w_t, bias, *, out_dtype=jnp.float32, tm=256, tn=512, tk=1024):
    """x: (N, K), w_t: (K, V), bias: (V,) -> (N, V) in out_dtype.  Tiled over N, V, K."""
    N, K = x.shape
    V = w_t.shape[1]

    TM = _pick_tile(N, 8, tm)
    TN = _pick_tile(V, 128, tn)
    TK = _pick_tile(K, 128, tk)          # never pads K past the next 128 multiple
    Np, Vp, Kp = _round_up(N, TM), _round_up(V, TN), _round_up(K, TK)

    xp = x.astype(w_t.dtype)
    if (Np, Kp) != (N, K):
        xp = jnp.pad(xp, ((0, Np - N), (0, Kp - K)))
    wp = w_t
    if (Kp, Vp) != (K, V):
        wp = jnp.pad(wp, ((0, Kp - K), (0, Vp - V)))
    bp = bias.reshape(1, V)
    if Vp != V:
        bp = jnp.pad(bp, ((0, 0), (0, Vp - V)))

    out = pl.pallas_call(
        _matmul_bias_kernel,
        out_shape=jax.ShapeDtypeStruct((Np, Vp), out_dtype),
        grid_spec=pltpu.PrefetchScalarGridSpec(
            num_scalar_prefetch=0,
            grid=(Np // TM, Vp // TN, Kp // TK),
            in_specs=[
                pl.BlockSpec((TM, TK), lambda i, j, k: (i, k)),
                pl.BlockSpec((TK, TN), lambda i, j, k: (k, j)),
                pl.BlockSpec((1, TN), lambda i, j, k: (0, j)),
            ],
            out_specs=pl.BlockSpec((TM, TN), lambda i, j, k: (i, j)),
            scratch_shapes=[pltpu.VMEM((TM, TN), jnp.float32)],
        ),
        compiler_params=pltpu.CompilerParams(
            dimension_semantics=("parallel", "parallel", "arbitrary")),
    )(xp, wp, bp)
    if (Np, Vp) != (N, V):
        out = out[:N, :V]
    return out


# ----------------------------- LSTM recurrence kernel -----------------------------
# gates_x (= x @ W_ih^T + b_ih + b_hh) is precomputed; the kernel only does the
# recurrent matmul + elementwise gates, t_chunk timesteps per grid step.

def _lstm_rec_kernel(gx_ref, h0_ref, c0_ref, whh_ref,
                     y_ref, hN_ref, cN_ref, h_sc, c_sc,
                     *, nhid_p, t_chunk, unroll, approx_sigmoid):
    t_blk = pl.program_id(1)

    @pl.when(t_blk == 0)
    def _():
        h_sc[...] = h0_ref[...]
        c_sc[...] = c0_ref[...]

    H = nhid_p

    def step(t, carry):
        h_prev = h_sc[...]
        c_prev = c_sc[...]
        gates = gx_ref[t].astype(jnp.float32) + jnp.dot(
            h_prev.astype(whh_ref.dtype), whh_ref[...],
            preferred_element_type=jnp.float32)
        # Gate columns packed [i, f, o, g], each padded to a lane-dense Hp block:
        # one sigmoid covers the contiguous 3*Hp slice, one tanh the last Hp slice.
        pre = gates[:, :3 * H]
        if approx_sigmoid:
            ifo = pl.reciprocal(1.0 + jnp.exp(-pre), approx=True)   # EUP, off the VALU
        else:
            ifo = jax.nn.sigmoid(pre)
        g_g = jnp.tanh(gates[:, 3 * H:])
        i_g = ifo[:, 0 * H:1 * H]
        f_g = ifo[:, 1 * H:2 * H]
        o_g = ifo[:, 2 * H:3 * H]
        c_new = f_g * c_prev + i_g * g_g
        h_new = o_g * jnp.tanh(c_new)
        h_sc[...] = h_new
        c_sc[...] = c_new
        y_ref[t] = h_new.astype(y_ref.dtype)
        return carry

    jax.lax.fori_loop(0, t_chunk, step, 0, unroll=unroll)

    @pl.when(t_blk == pl.num_programs(1) - 1)
    def _():
        hN_ref[...] = h_sc[...]
        cN_ref[...] = c_sc[...]


def lstm_recurrence(gates_x, h0, c0, whh_t, *, y_dtype=None, t_chunk=None,
                    batch_tile=None, approx_sigmoid=False,
                    vmem_budget_bytes=24 * 1024 * 1024):
    """gates_x: (S, Bp, 4*Hp) (gate cols [i,f,o,g], Hp % 128 == 0, Bp % 8 == 0),
    h0/c0: (Bp, Hp) f32, whh_t: (Hp, 4*Hp).  Returns y (S, Bp, Hp), hN, cN.
    On v7x pass batch_tile=Bp//2 (>=8) to spread the recurrence over both TensorCores."""
    S, Bp, G = gates_x.shape
    Hp = h0.shape[-1]
    assert G == 4 * Hp and Hp % 128 == 0
    assert Bp % 8 == 0
    if y_dtype is None:
        y_dtype = gates_x.dtype

    TB = Bp if batch_tile is None else batch_tile
    assert TB % 8 == 0 and Bp % TB == 0

    if t_chunk is None:
        gx_b = jnp.dtype(gates_x.dtype).itemsize
        y_b = jnp.dtype(y_dtype).itemsize
        whh_b = jnp.dtype(whh_t.dtype).itemsize
        fixed = 2 * Hp * 4 * Hp * whh_b + 8 * TB * Hp * 4      # W_hh (2-buf) + h/c state
        per_t = 2 * TB * 4 * Hp * gx_b + 2 * TB * Hp * y_b     # 2-buffered gx + y chunks
        max_chunk = max(1, (vmem_budget_bytes - fixed) // per_t)
        t_chunk = _largest_divisor_leq(S, min(32, max_chunk))
    assert S % t_chunk == 0, "t_chunk must divide the sequence length"

    kernel = functools.partial(_lstm_rec_kernel, nhid_p=Hp, t_chunk=t_chunk,
                               unroll=min(8, t_chunk), approx_sigmoid=approx_sigmoid)
    out_shape = (jax.ShapeDtypeStruct((S, Bp, Hp), y_dtype),
                 jax.ShapeDtypeStruct((Bp, Hp), jnp.float32),
                 jax.ShapeDtypeStruct((Bp, Hp), jnp.float32))

    y, hN, cN = pl.pallas_call(
        kernel,
        out_shape=out_shape,
        grid_spec=pltpu.PrefetchScalarGridSpec(
            num_scalar_prefetch=0,
            grid=(Bp // TB, S // t_chunk),
            in_specs=[
                pl.BlockSpec((t_chunk, TB, 4 * Hp), lambda b, s: (s, b, 0)),  # gx chunk
                pl.BlockSpec((TB, Hp), lambda b, s: (b, 0)),                  # h0
                pl.BlockSpec((TB, Hp), lambda b, s: (b, 0)),                  # c0
                pl.BlockSpec((Hp, 4 * Hp), lambda b, s: (0, 0)),              # W_hh^T resident
            ],
            out_specs=[
                pl.BlockSpec((t_chunk, TB, Hp), lambda b, s: (s, b, 0)),      # y chunk
                pl.BlockSpec((TB, Hp), lambda b, s: (b, 0)),                  # h_final
                pl.BlockSpec((TB, Hp), lambda b, s: (b, 0)),                  # c_final
            ],
            scratch_shapes=[pltpu.VMEM((TB, Hp), jnp.float32),
                            pltpu.VMEM((TB, Hp), jnp.float32)],
        ),
        compiler_params=pltpu.CompilerParams(
            dimension_semantics=("parallel", "arbitrary"),
            vmem_limit_bytes=48 * 1024 * 1024),
    )(gates_x, h0, c0, whh_t)
    return y, hN, cN


# ------------------------------ Params / packing ---------------------------------

def init_params(key, ntoken, ninp, nhid, nlayers):
    initrange = 0.1
    keys = jax.random.split(key, 3 + 4 * nlayers)
    params = {
        "encoder_w": jax.random.uniform(keys[0], (ntoken, ninp), jnp.float32,
                                        -initrange, initrange),
        "decoder_w": jax.random.uniform(keys[1], (ntoken, nhid), jnp.float32,
                                        -initrange, initrange),
        "decoder_b": jnp.zeros((ntoken,), jnp.float32),
        "lstm": [],
    }
    stdv = 1.0 / float(nhid) ** 0.5
    for l in range(nlayers):
        in_dim = ninp if l == 0 else nhid
        k = keys[3 + 4 * l: 3 + 4 * (l + 1)]
        params["lstm"].append({
            "w_ih": jax.random.uniform(k[0], (4 * nhid, in_dim), jnp.float32, -stdv, stdv),
            "w_hh": jax.random.uniform(k[1], (4 * nhid, nhid), jnp.float32, -stdv, stdv),
            "b_ih": jax.random.uniform(k[2], (4 * nhid,), jnp.float32, -stdv, stdv),
            "b_hh": jax.random.uniform(k[3], (4 * nhid,), jnp.float32, -stdv, stdv),
        })
    return params


def _reorder_pad_gates(w, H, Hp):
    """Leading 4H axis: PyTorch [i, f, g, o] -> [i, f, o, g], each gate block zero-padded
    from H to Hp rows so all gate slices land on lane-dense 128 boundaries."""
    i, f, g, o = w[0:H], w[H:2 * H], w[2 * H:3 * H], w[3 * H:4 * H]
    pad = [(0, Hp - H)] + [(0, 0)] * (w.ndim - 1)
    return jnp.concatenate([jnp.pad(b, pad) for b in (i, f, o, g)], axis=0)


def pack_params(params, dtype=jnp.float32):
    """One-time weight prep: transpose, fuse biases, reorder gate columns to [i,f,o,g],
    and pad nhid/ninp to multiples of 128.  dtype=jnp.bfloat16 halves weight streaming
    (the recurrence is W_hh-streaming bound at small batch) on all generations."""
    ntoken, ninp = params["encoder_w"].shape
    nhid = params["lstm"][0]["w_hh"].shape[1]
    ninp_p = _round_up(ninp, 128)
    Hp = _round_up(nhid, 128)

    enc = params["encoder_w"]
    if ninp_p != ninp:
        enc = jnp.pad(enc, ((0, 0), (0, ninp_p - ninp)))
    dec_w_t = jnp.transpose(
        jnp.pad(params["decoder_w"], ((0, 0), (0, Hp - nhid)))).astype(dtype)   # (Hp, ntoken)

    packed = {
        "encoder_w": enc,                  # (ntoken, ninp_p)
        "decoder_w_t": dec_w_t,
        "decoder_b": params["decoder_b"],
        "ntoken": ntoken, "nhid": nhid, "nhid_p": Hp,
        "lstm": [],
    }
    for l, lp in enumerate(params["lstm"]):
        in_dim = lp["w_ih"].shape[1]
        in_dim_p = ninp_p if l == 0 else Hp
        w_ih = _reorder_pad_gates(lp["w_ih"], nhid, Hp)          # (4Hp, in_dim)
        w_ih = jnp.pad(w_ih, ((0, 0), (0, in_dim_p - in_dim)))
        w_hh = _reorder_pad_gates(lp["w_hh"], nhid, Hp)          # (4Hp, nhid)
        w_hh = jnp.pad(w_hh, ((0, 0), (0, Hp - nhid)))
        bias = _reorder_pad_gates(lp["b_ih"] + lp["b_hh"], nhid, Hp)
        packed["lstm"].append({
            "w_ih_t": jnp.transpose(w_ih).astype(dtype),         # (in_dim_p, 4Hp)
            "w_hh_t": jnp.transpose(w_hh).astype(dtype),         # (Hp, 4Hp)
            "bias": bias,                                        # (4Hp,) f32
        })
    return packed


# ------------------------------ Model forward (glue) -------------------------------

def rnn_model_forward(packed, tokens, hidden, *, act_dtype=jnp.float32,
                      approx_sigmoid=None, batch_tile=None):
    """tokens: (S, B) int32; hidden = (h0, c0) each (nlayers, B, nhid).
    act_dtype controls the dtype of gates_x / inter-layer y / decoder output
    (bf16 halves the HBM round trips between kernels; math stays f32)."""
    if approx_sigmoid is None:
        approx_sigmoid = (act_dtype != jnp.float32)
    h0_all, c0_all = hidden
    S, B = tokens.shape
    nhid, Hp, ntoken = packed["nhid"], packed["nhid_p"], packed["ntoken"]
    Bp = _round_up(B, 8)

    # Encoder (embedding gather) + dropout (eval-mode identity): plain JAX glue.
    x = jnp.take(packed["encoder_w"], tokens, axis=0)            # (S, B, ninp_p)
    if Bp != B:
        x = jnp.pad(x, ((0, 0), (0, Bp - B), (0, 0)))
    # Pad hidden state batch/H once; padded lanes/rows stay consistent all the way through.
    h_all = jnp.pad(h0_all, ((0, 0), (0, Bp - B), (0, Hp - nhid)))
    c_all = jnp.pad(c0_all, ((0, 0), (0, Bp - B), (0, Hp - nhid)))

    h_finals, c_finals = [], []
    for l, lp in enumerate(packed["lstm"]):
        D = x.shape[-1]
        # Hoisted input projection: one big MXU matmul over the whole sequence.
        # Bias added exactly once here (NOT in the recurrence).
        gx = matmul_bias(x.reshape(S * Bp, D), lp["w_ih_t"], lp["bias"],
                         out_dtype=act_dtype).reshape(S, Bp, 4 * Hp)
        x, hN, cN = lstm_recurrence(gx, h_all[l], c_all[l], lp["w_hh_t"],
                                    y_dtype=act_dtype, approx_sigmoid=approx_sigmoid,
                                    batch_tile=batch_tile)
        h_finals.append(hN)
        c_finals.append(cN)
        # inter-layer dropout: identity in eval mode

    decoded = matmul_bias(x.reshape(S * Bp, Hp), packed["decoder_w_t"],
                          packed["decoder_b"], out_dtype=act_dtype)
    decoded = decoded.reshape(S, Bp, -1)[:, :B, :ntoken]          # (S, B, ntoken)
    hN = jnp.stack(h_finals, 0)[:, :B, :nhid]
    cN = jnp.stack(c_finals, 0)[:, :B, :nhid]
    return decoded, (hN, cN)


# ------------------------------ Pure-JAX reference ---------------------------------

def _reference_forward(params, tokens, hidden):
    h0_all, c0_all = hidden
    S, B = tokens.shape
    x = params["encoder_w"][tokens]
    h_finals, c_finals = [], []
    for l, lp in enumerate(params["lstm"]):
        H = lp["w_hh"].shape[1]
        h = h0_all[l]
        c = c0_all[l]
        ys = []
        for t in range(S):
            g = (x[t] @ lp["w_ih"].T + lp["b_ih"] + h @ lp["w_hh"].T + lp["b_hh"])
            i = jax.nn.sigmoid(g[:, 0 * H:1 * H])
            f = jax.nn.sigmoid(g[:, 1 * H:2 * H])
            gg = jnp.tanh(g[:, 2 * H:3 * H])
            o = jax.nn.sigmoid(g[:, 3 * H:4 * H])
            c = f * c + i * gg
            h = o * jnp.tanh(c)
            ys.append(h)
        x = jnp.stack(ys, 0)
        h_finals.append(h)
        c_finals.append(c)
    dec = x.reshape(S * B, -1) @ params["decoder_w"].T + params["decoder_b"]
    return dec.reshape(S, B, -1), (jnp.stack(h_finals, 0), jnp.stack(c_finals, 0))


# ----------------------------------- main -------------------------------------------

if __name__ == "__main__":
    ntoken, ninp, nhid, nlayers = 128, 32, 32, 2
    seq_len, batch = 8, 2

    key = jax.random.PRNGKey(0)
    pkey, tkey = jax.random.split(key)
    params = init_params(pkey, ntoken, ninp, nhid, nlayers)

    tokens = jax.random.randint(tkey, (seq_len, batch), 0, ntoken, dtype=jnp.int32)
    h0 = jnp.zeros((nlayers, batch, nhid), jnp.float32)   # init_hidden (LSTM)
    c0 = jnp.zeros((nlayers, batch, nhid), jnp.float32)

    ref_dec, (ref_h, ref_c) = _reference_forward(params, tokens, (h0, c0))

    # --- exact path: f32 weights + f32 activations (tight tolerance) ---
    packed_f32 = pack_params(params, dtype=jnp.float32)
    dec32, (h32, c32) = rnn_model_forward(packed_f32, tokens, (h0, c0),
                                          act_dtype=jnp.float32, approx_sigmoid=False)
    jax.block_until_ready(dec32)
    jax.block_until_ready(h32)
    jax.block_until_ready(c32)
    assert dec32.shape == (seq_len, batch, ntoken)
    assert h32.shape == (nlayers, batch, nhid) and c32.shape == (nlayers, batch, nhid)
    assert jnp.allclose(dec32, ref_dec, atol=2e-5, rtol=2e-5)
    assert jnp.allclose(h32, ref_h, atol=2e-5, rtol=2e-5)
    assert jnp.allclose(c32, ref_c, atol=2e-5, rtol=2e-5)

    # --- perf path: bf16 weights + bf16 activations + approx sigmoid (loose tolerance) ---
    packed_bf16 = pack_params(params, dtype=jnp.bfloat16)
    dec16, (h16, c16) = rnn_model_forward(packed_bf16, tokens, (h0, c0),
                                          act_dtype=jnp.bfloat16, approx_sigmoid=True)
    jax.block_until_ready(dec16)
    assert dec16.shape == (seq_len, batch, ntoken)
    assert jnp.allclose(dec16.astype(jnp.float32), ref_dec, atol=5e-2, rtol=5e-2)
    assert jnp.allclose(h16.astype(jnp.float32), ref_h, atol=5e-2, rtol=5e-2)
    assert jnp.allclose(c16.astype(jnp.float32), ref_c, atol=5e-2, rtol=5e-2)

    print("KERNEL_OK")
</pallas_src>

<mosaic_0001>
module attributes {stable_mosaic.version = 11 : i64} {
  func.func @_matmul_bias_kernel(%arg0: i32, %arg1: i32, %arg2: i32, %arg3: memref<64x128xf32, #tpu.memory_space<vmem>>, %arg4: memref<128x512xf32, #tpu.memory_space<vmem>>, %arg5: memref<1x512xf32, #tpu.memory_space<vmem>>, %arg6: memref<64x512xf32, #tpu.memory_space<vmem>>, %arg7: memref<64x512xf32, #tpu.memory_space<vmem>>) attributes {dimension_semantics = [#tpu.dimension_semantics<parallel>, #tpu.dimension_semantics<parallel>, #tpu.dimension_semantics<arbitrary>], iteration_bounds = array<i64: 1, 1, 1>, scalar_prefetch = 0 : i64, scratch_operands = 1 : i64, tpu.core_type = #tpu.core_type<tc>, window_params = [{transform_indices = @transform_0, window_bounds = array<i64: 64, 128>}, {transform_indices = @transform_1, window_bounds = array<i64: 128, 512>}, {transform_indices = @transform_2, window_bounds = array<i64: 1, 512>}, {transform_indices = @transform_3, window_bounds = array<i64: 64, 512>}]} {
    %c0_i32 = arith.constant 0 : i32
    %0 = arith.cmpi eq, %arg2, %c0_i32 : i32
    %1 = arith.extui %0 : i1 to i32
    %c0_i32_0 = arith.constant 0 : i32
    %2 = arith.cmpi ne, %1, %c0_i32_0 : i32
    scf.if %2 {
      %cst_10 = arith.constant 0.000000e+00 : f32
      %12 = vector.broadcast %cst_10 : f32 to vector<64x512xf32>
      %c0_11 = arith.constant 0 : index
      %c0_12 = arith.constant 0 : index
      %13 = vector.load %arg7[%c0_11, %c0_12] : memref<64x512xf32, #tpu.memory_space<vmem>>, vector<64x512xf32>
      tpu.vector_store %arg7[%c0_11, %c0_12], %12 {strides = array<i32>} : memref<64x512xf32, #tpu.memory_space<vmem>>, vector<64x512xf32>,
    } else {
    }
    %c0 = arith.constant 0 : index
    %c0_1 = arith.constant 0 : index
    %3 = vector.load %arg7[%c0, %c0_1] : memref<64x512xf32, #tpu.memory_space<vmem>>, vector<64x512xf32>
    %c0_2 = arith.constant 0 : index
    %c0_3 = arith.constant 0 : index
    %4 = vector.load %arg3[%c0_2, %c0_3] : memref<64x128xf32, #tpu.memory_space<vmem>>, vector<64x128xf32>
    %c0_4 = arith.constant 0 : index
    %c0_5 = arith.constant 0 : index
    %5 = vector.load %arg4[%c0_4, %c0_5] : memref<128x512xf32, #tpu.memory_space<vmem>>, vector<128x512xf32>
    %cst = arith.constant dense<0.000000e+00> : vector<64x512xf32>
    %6 = tpu.matmul %4, %5, %cst {dimension_numbers = #tpu.dot_dimension_numbers<[1], [0], [0], [1], [0, 0, 1, 1], [], []>} : vector<64x128xf32>, vector<128x512xf32>, vector<64x512xf32> -> vector<64x512xf32>
    %7 = arith.addf %3, %6 : vector<64x512xf32>
    %c0_6 = arith.constant 0 : index
    %c0_7 = arith.constant 0 : index
    %8 = vector.load %arg7[%c0_6, %c0_7] : memref<64x512xf32, #tpu.memory_space<vmem>>, vector<64x512xf32>
    tpu.vector_store %arg7[%c0_6, %c0_7], %7 {strides = array<i32>} : memref<64x512xf32, #tpu.memory_space<vmem>>, vector<64x512xf32>,
    %c0_i32_8 = arith.constant 0 : i32
    %9 = arith.cmpi eq, %arg2, %c0_i32_8 : i32
    %10 = arith.extui %9 : i1 to i32
    %c0_i32_9 = arith.constant 0 : i32
    %11 = arith.cmpi ne, %10, %c0_i32_9 : i32
    scf.if %11 {
      %c0_10 = arith.constant 0 : index
      %c0_11 = arith.constant 0 : index
      %12 = vector.load %arg7[%c0_10, %c0_11] : memref<64x512xf32, #tpu.memory_space<vmem>>, vector<64x512xf32>
      %c0_12 = arith.constant 0 : index
      %c0_13 = arith.constant 0 : index
      %13 = vector.load %arg5[%c0_12, %c0_13] : memref<1x512xf32, #tpu.memory_space<vmem>>, vector<1x512xf32>
      %14 = vector.broadcast %13 : vector<1x512xf32> to vector<64x512xf32>
      %15 = arith.addf %12, %14 : vector<64x512xf32>
      %c0_14 = arith.constant 0 : index
      %c0_15 = arith.constant 0 : index
      %16 = vector.load %arg6[%c0_14, %c0_15] : memref<64x512xf32, #tpu.memory_space<vmem>>, vector<64x512xf32>
      tpu.vector_store %arg6[%c0_14, %c0_15], %15 {strides = array<i32>} : memref<64x512xf32, #tpu.memory_space<vmem>>, vector<64x512xf32>,
    } else {
    }
    return
  }
  func.func @transform_0(%arg0: i32, %arg1: i32, %arg2: i32) -> (i32, i32) {
    %c0_i32 = arith.constant 0 : i32
    return %arg0, %arg2 : i32, i32
  }
  func.func @transform_1(%arg0: i32, %arg1: i32, %arg2: i32) -> (i32, i32) {
    %c0_i32 = arith.constant 0 : i32
    return %arg2, %arg1 : i32, i32
  }
  func.func @transform_2(%arg0: i32, %arg1: i32, %arg2: i32) -> (i32, i32) {
    %c0_i32 = arith.constant 0 : i32
    %c0_i32_0 = arith.constant 0 : i32
    return %c0_i32, %arg1 : i32, i32
  }
  func.func @transform_3(%arg0: i32, %arg1: i32, %arg2: i32) -> (i32, i32) {
    %c0_i32 = arith.constant 0 : i32
    return %arg0, %arg1 : i32, i32
  }
}

</mosaic_0001>

<bundles_post_ra>
// kernel: tpu_custom_call.1
= control target key start
LH: loop header
LB: loop body
LE: loop exit
PB: predicated region body
PF: predicated region fallthrough
CT: control target
= control target key end

     0   :  { %8 = vsyncpa [#allocation4], 0  ;;  %s885_s0 = inlined_call_operand.hbm [shape: f32[64,128], index: 0, kind: input, shape index: {}]   ;;  %s886_s1 = inlined_call_operand.hbm [shape: f32[128,512], index: 1, kind: input, shape index: {}]   ;;  %s887_s2 = inlined_call_operand.vmem [shape: f32[1,512], index: 2, kind: input, shape index: {}]   ;;  %s888_s3 = inlined_call_operand.hbm [shape: f32[64,512], index: 3, kind: output, shape index: {}]  }
   0x1   :  { %9 = vsyncpa [#allocation7], 0 }
   0x2   :  { %10 = vsyncpa [#allocation5], 0  ;;  %s756_s12 = smov [#allocation3]   ;;  %s684_s16 = scalar_lea.hbm %s885_s0, 1024 }
   0x3   :  { %s16_s13 = sshll.u32 %s756_s12, 4  ;;  %p685_p0 = scmp.ne.s32.totalorder %s885_s0, %s684_s16  ;;  %s17_s13 = int_to_ptr.vmem [resolvable:$true] %s16_s13 }
   0x4   :  { %p688_p1 = scmp.lt.u32.totalorder %s684_s16, %s885_s0 }
   0x6   :  { %p690_p2 = pnand %p688_p1, %p685_p0 }
   0x8   :  { %693 = shalt.err (!%p690_p2)
}
   0x9   :  { %s694_s21 = scalar_lea.vmem %s17_s13, 1024  ;;  %p699_p4 = scmp.lt.s32.totalorder %s17_s13, %s17_s13 }
   0xa   :  { %p695_p3 = scmp.ne.s32.totalorder %s17_s13, %s694_s21  ;;  %p700_p5 = scmp.lt.s32.totalorder %s694_s21, %s694_s21 }
   0xc   :  { %p701_p6 = por %p700_p5, %p699_p4 }
   0xe   :  { %p702_p7 = pnand %p701_p6, %p695_p3 }
  0x10   :  { %705 = shalt.err (!%p702_p7)
}
  0x11   :  { %s757_s22 = smov 128   ;;  %s758_s23 = smov 8  }
  0x12   :  { %22 = dma.hbm_to_vmem [thread:$0]  %s885_s0, 1024, %s17_s13, [#allocation4], %s757_s22, %s757_s22, %s758_s23  }
  0x13   :  { %s759_s26 = smov [#allocation6]   ;;  %s706_s30 = scalar_lea.hbm %s886_s1, 8192 }
  0x14   :  { %s28_s27 = sshll.u32 %s759_s26, 4  ;;  %p707_p8 = scmp.ne.s32.totalorder %s886_s1, %s706_s30  ;;  %s29_s27 = int_to_ptr.vmem [resolvable:$true] %s28_s27 }
  0x15   :  { %p710_p9 = scmp.lt.u32.totalorder %s706_s30, %s886_s1 }
  0x17   :  { %p712_p10 = pnand %p710_p9, %p707_p8 }
  0x19   :  { %715 = shalt.err (!%p712_p10)
}
  0x1a   :  { %s716_s8 = scalar_lea.vmem %s29_s27, 8192  ;;  %p721_p12 = scmp.lt.s32.totalorder %s29_s27, %s29_s27 }
  0x1b   :  { %p717_p11 = scmp.ne.s32.totalorder %s29_s27, %s716_s8  ;;  %p722_p13 = scmp.lt.s32.totalorder %s716_s8, %s716_s8 }
  0x1d   :  { %p723_p0 = por %p722_p13, %p721_p12 }
  0x1f   :  { %p724_p1 = pnand %p723_p0, %p717_p11 }
  0x21   :  { %727 = shalt.err (!%p724_p1)
}
  0x22   :  { %s760_s0 = smov 512   ;;  %s761_s9 = smov 32  }
  0x23   :  { %34 = dma.hbm_to_vmem [thread:$0]  %s886_s1, 8192, %s29_s27, [#allocation7], %s760_s0, %s760_s0, %s761_s9  }
  0x24   :  { %750 = dma.done.wait [#allocation4], 1024  }
  0x25   :  { %751 = vsyncadd [#allocation4], 4294966272 }
  0x26   :  { %752 = dma.done.wait [#allocation7], 8192  }
  0x27   :  { %753 = vsyncadd [#allocation7], 4294959104  ;;  %v762_v0 = vmov 0.0   ;;  %v120_v1 = vld [vmem:[#allocation6 + $0x8] sm:$0xff]  ;;  %v122_v3 = vld [vmem:[#allocation6 + $0x18] sm:$0xff] }
  0x28   :  { %247 = vmatprep.mubr.f32.mxu0 %v762_v0  ;;  %360 = vmatprep.mubr.f32.mxu1 %v762_v0  ;;  %v124_v2 = vld [vmem:[#allocation6 + $0x28] sm:$0xff]  ;;  %v126_v5 = vld [vmem:[#allocation6 + $0x38] sm:$0xff]  ;;  %v119_v6 = vld [vmem:[#allocation6] sm:$0xff] }
  0x29   :  { %v612_v4 = vpack.c.bf16 %v124_v2, %v120_v1  ;;  %v123_v7 = vld [vmem:[#allocation6 + $0x20] sm:$0xff]  ;;  %v644_v8 = vpack.c.bf16 %v126_v5, %v122_v3  ;;  %v121_v10 = vld [vmem:[#allocation6 + $0x10] sm:$0xff]  ;;  %v128_v12 = vld [vmem:[#allocation6 + $0x48] sm:$0xff] }
  0x2a   :  { %v614_v9 = vpack.c.bf16 %v123_v7, %v119_v6  ;;  %v125_v11 = vld [vmem:[#allocation6 + $0x30] sm:$0xff]  ;;  %v132_v14 = vld [vmem:[#allocation6 + $0x68] sm:$0xff]  ;;  %v130_v15 = vld [vmem:[#allocation6 + $0x58] sm:$0xff] }
  0x2b   :  { %613 = vmatprep.subr.bf16.mxu0 %v612_v4  ;;  %v646_v13 = vpack.c.bf16 %v125_v11, %v121_v10  ;;  %v134_v16 = vld [vmem:[#allocation6 + $0x78] sm:$0xff]  ;;  %645 = vmatprep.subr.bf16.mxu1 %v644_v8  ;;  %v616_v17 = vpack.c.bf16 %v132_v14, %v128_v12  ;;  %v127_v19 = vld [vmem:[#allocation6 + $0x40] sm:$0xff]  ;;  %v129_v21 = vld [vmem:[#allocation6 + $0x50] sm:$0xff] }
  0x2c   :  { %615 = vmatpush1.bf16.msra.mxu0 %v614_v9  ;;  %v648_v18 = vpack.c.bf16 %v134_v16, %v130_v15  ;;  %v131_v20 = vld [vmem:[#allocation6 + $0x60] sm:$0xff]  ;;  %v133_v23 = vld [vmem:[#allocation6 + $0x70] sm:$0xff]  ;;  %v136_v24 = vld [vmem:[#allocation6 + $0x88] sm:$0xff] }
  0x2d   :  { %647 = vmatpush1.bf16.msra.mxu1 %v646_v13  ;;  %v618_v22 = vpack.c.bf16 %v131_v20, %v127_v19  ;;  %v140_v25 = vld [vmem:[#allocation6 + $0xa8] sm:$0xff]  ;;  %617 = vmatprep.subr.bf16.mxu0 %v616_v17  ;;  %v650_v26 = vpack.c.bf16 %v133_v23, %v129_v21  ;;  %v138_v28 = vld [vmem:[#allocation6 + $0x98] sm:$0xff]  ;;  %v135_v30 = vld [vmem:[#allocation6 + $0x80] sm:$0xff] }
  0x2e   :  { %649 = vmatprep.subr.bf16.mxu1 %v648_v18  ;;  %v620_v27 = vpack.c.bf16 %v140_v25, %v136_v24  ;;  %v142_v29 = vld [vmem:[#allocation6 + $0xb8] sm:$0xff]  ;;  %v139_v32 = vld [vmem:[#allocation6 + $0xa0] sm:$0xff]  ;;  %v137_v33 = vld [vmem:[#allocation6 + $0x90] sm:$0xff] }
  0x2f   :  { %v652_v31 = vpack.c.bf16 %v142_v29, %v138_v28  ;;  %v141_v34 = vld [vmem:[#allocation6 + $0xb0] sm:$0xff]  ;;  %v622_v35 = vpack.c.bf16 %v139_v32, %v135_v30  ;;  %v144_v36 = vld [vmem:[#allocation6 + $0xc8] sm:$0xff]  ;;  %v146_v38 = vld [vmem:[#allocation6 + $0xd8] sm:$0xff] }
  0x30   :  { %619 = vmatpush1.bf16.msra.mxu0 %v618_v22  ;;  %v148_v37 = vld [vmem:[#allocation6 + $0xe8] sm:$0xff]  ;;  %v654_v39 = vpack.c.bf16 %v141_v34, %v137_v33  ;;  %v150_v41 = vld [vmem:[#allocation6 + $0xf8] sm:$0xff]  ;;  %v143_v42 = vld [vmem:[#allocation6 + $0xc0] sm:$0xff] }
  0x31   :  { %651 = vmatpush1.bf16.msra.mxu1 %v650_v26  ;;  %621 = vmatprep.subr.bf16.mxu0 %v620_v27  ;;  %v624_v40 = vpack.c.bf16 %v148_v37, %v144_v36  ;;  %v147_v43 = vld [vmem:[#allocation6 + $0xe0] sm:$0xff]  ;;  %v656_v44 = vpack.c.bf16 %v150_v41, %v146_v38  ;;  %v145_v45 = vld [vmem:[#allocation6 + $0xd0] sm:$0xff]  ;;  %v152_v47 = vld [vmem:[#allocation6 + $0x108] sm:$0xff] }
  0x32   :  { %653 = vmatprep.subr.bf16.mxu1 %v652_v31  ;;  %v149_v46 = vld [vmem:[#allocation6 + $0xf0] sm:$0xff]  ;;  %v156_v48 = vld [vmem:[#allocation6 + $0x128] sm:$0xff]  ;;  %v154_v49 = vld [vmem:[#allocation6 + $0x118] sm:$0xff]  ;;  %v626_v51 = vpack.c.bf16 %v147_v43, %v143_v42  ;;  %v510_v42 = vlaneseq }
  0x33   :  { %v158_v50 = vld [vmem:[#allocation6 + $0x138] sm:$0xff]  ;;  %v658_v52 = vpack.c.bf16 %v149_v46, %v145_v45  ;;  %v628_v53 = vpack.c.bf16 %v156_v48, %v152_v47  ;;  %v151_v54 = vld [vmem:[#allocation6 + $0x100] sm:$0xff]  ;;  %v153_v56 = vld [vmem:[#allocation6 + $0x110] sm:$0xff] }
  0x34   :  { %623 = vmatpush1.bf16.msra.mxu0 %v622_v35  ;;  %v155_v55 = vld [vmem:[#allocation6 + $0x120] sm:$0xff]  ;;  %v660_v57 = vpack.c.bf16 %v158_v50, %v154_v49  ;;  %v157_v58 = vld [vmem:[#allocation6 + $0x130] sm:$0xff]  ;;  %v160_v59 = vld [vmem:[#allocation6 + $0x148] sm:$0xff]  ;;  %v511_v43 = vshrl.u32 %v510_v42, 7 }
  0x35   :  { %655 = vmatpush1.bf16.msra.mxu1 %v654_v39  ;;  %625 = vmatprep.subr.bf16.mxu0 %v624_v40  ;;  %v164_v60 = vld [vmem:[#allocation6 + $0x168] sm:$0xff]  ;;  %v162_v61 = vld [vmem:[#allocation6 + $0x158] sm:$0xff]  ;;  %v630_v63 = vpack.c.bf16 %v155_v55, %v151_v54  ;;  %v662_v1 = vpack.c.bf16 %v157_v58, %v153_v56  ;;  %v159_v3 = vld [vmem:[#allocation6 + $0x140] sm:$0xff] }
  0x36   :  { %657 = vmatprep.subr.bf16.mxu1 %v656_v44  ;;  %v166_v62 = vld [vmem:[#allocation6 + $0x178] sm:$0xff]  ;;  %v632_v2 = vpack.c.bf16 %v164_v60, %v160_v59  ;;  %v163_v4 = vld [vmem:[#allocation6 + $0x160] sm:$0xff]  ;;  %v161_v5 = vld [vmem:[#allocation6 + $0x150] sm:$0xff]  ;;  %v512_v44 = vsub.s32 0, %v511_v43  ;;  %v520_v46 = vsub.s32 2, %v511_v43  ;;  %v516_v47 = vsub.s32 1, %v511_v43 }
  0x37   :  { %v664_v6 = vpack.c.bf16 %v166_v62, %v162_v61  ;;  %v165_v7 = vld [vmem:[#allocation6 + $0x170] sm:$0xff]  ;;  %v168_v8 = vld [vmem:[#allocation6 + $0x188] sm:$0xff]  ;;  %v170_v10 = vld [vmem:[#allocation6 + $0x198] sm:$0xff]  ;;  %v634_v12 = vpack.c.bf16 %v163_v4, %v159_v3  ;;  %v524_v48 = vsub.s32 3, %v511_v43 }
  0x38   :  { %627 = vmatpush1.bf16.msra.mxu0 %v626_v51  ;;  %v172_v9 = vld [vmem:[#allocation6 + $0x1a8] sm:$0xff]  ;;  %v174_v11 = vld [vmem:[#allocation6 + $0x1b8] sm:$0xff]  ;;  %v666_v13 = vpack.c.bf16 %v165_v7, %v161_v5  ;;  %v167_v15 = vld [vmem:[#allocation6 + $0x180] sm:$0xff] }
  0x39   :  { %659 = vmatpush1.bf16.msra.mxu1 %v658_v52  ;;  %629 = vmatprep.subr.bf16.mxu0 %v628_v53  ;;  %v636_v14 = vpack.c.bf16 %v172_v9, %v168_v8  ;;  %v171_v16 = vld [vmem:[#allocation6 + $0x1a0] sm:$0xff]  ;;  %v169_v17 = vld [vmem:[#allocation6 + $0x190] sm:$0xff]  ;;  %v668_v18 = vpack.c.bf16 %v174_v11, %v170_v10  ;;  %v176_v20 = vld [vmem:[#allocation6 + $0x1c8] sm:$0xff] }
  0x3a   :  { %661 = vmatprep.subr.bf16.mxu1 %v660_v57  ;;  %v173_v19 = vld [vmem:[#allocation6 + $0x1b0] sm:$0xff]  ;;  %v180_v21 = vld [vmem:[#allocation6 + $0x1e8] sm:$0xff]  ;;  %v178_v22 = vld [vmem:[#allocation6 + $0x1d8] sm:$0xff]  ;;  %v638_v24 = vpack.c.bf16 %v171_v16, %v167_v15 }
  0x3b   :  { %v182_v23 = vld [vmem:[#allocation6 + $0x1f8] sm:$0xff]  ;;  %v670_v25 = vpack.c.bf16 %v173_v19, %v169_v17  ;;  %v640_v26 = vpack.c.bf16 %v180_v21, %v176_v20  ;;  %v175_v27 = vld [vmem:[#allocation6 + $0x1c0] sm:$0xff]  ;;  %v177_v30 = vld [vmem:[#allocation6 + $0x1d0] sm:$0xff] }
  0x3c   :  { %631 = vmatpush1.bf16.msra.mxu0 %v630_v63  ;;  %v179_v28 = vld [vmem:[#allocation6 + $0x1e0] sm:$0xff]  ;;  %v672_v29 = vpack.c.bf16 %v182_v23, %v178_v22  ;;  %v181_v31 = vld [vmem:[#allocation6 + $0x1f0] sm:$0xff]  ;;  %v112_v35 = vld [vmem:[#allocation3 + $0x8] sm:$0xff] }
  0x3d   :  { %663 = vmatpush1.bf16.msra.mxu1 %v662_v1  ;;  %633 = vmatprep.subr.bf16.mxu0 %v632_v2  ;;  %v642_v32 = vpack.c.bf16 %v179_v28, %v175_v27  ;;  %v674_v33 = vpack.c.bf16 %v181_v31, %v177_v30  ;;  %v111_v34 = vld [vmem:[#allocation3] sm:$0xff]  ;;  %v113_v36 = vld [vmem:[#allocation3 + $0x10] sm:$0xff]  ;;  %v114_v37 = vld [vmem:[#allocation3 + $0x18] sm:$0xff] }
  0x3e   :  { %665 = vmatprep.subr.bf16.mxu1 %v664_v6  ;;  %v115_v38 = vld [vmem:[#allocation3 + $0x20] sm:$0xff]  ;;  %v116_v39 = vld [vmem:[#allocation3 + $0x28] sm:$0xff]  ;;  %v117_v40 = vld [vmem:[#allocation3 + $0x30] sm:$0xff] }
  0x3f   :  { %v118_v41 = vld [vmem:[#allocation3 + $0x38] sm:$0xff]  ;;  %v508_v45 = vld [vmem:[%s887_s2] sm:$0xf]  ;;  %s763_s2 = smov [#allocation8]  }
  0x40   :  { %635 = vmatpush1.bf16.msra.mxu0 %v634_v12  ;;  %v830_v49 = vrot.slane %v508_v45, %v512_v44  ;;  %v832_v50 = vrot.slane %v508_v45, %v520_v46  ;;  %v834_v51 = vrot.slane %v508_v45, %v516_v47  ;;  %v836_v52 = vrot.slane %v508_v45, %v524_v48  ;;  %s599_s13 = sshll.u32 %s763_s2, 4  ;;  %s600_s13 = int_to_ptr.vmem [resolvable:$true] %s599_s13 }
  0x41   :  { %667 = vmatpush1.bf16.msra.mxu1 %v666_v13  ;;  %637 = vmatprep.subr.bf16.mxu0 %v636_v14  ;;  %s728_s14 = scalar_lea.vmem %s600_s13, 4096  ;;  %p733_p3 = scmp.lt.s32.totalorder %s600_s13, %s600_s13 }
  0x42   :  { %669 = vmatprep.subr.bf16.mxu1 %v668_v18  ;;  %p729_p2 = scmp.ne.s32.totalorder %s600_s13, %s728_s14  ;;  %p734_p4 = scmp.lt.s32.totalorder %s728_s14, %s728_s14 }
  0x44   :  { %639 = vmatpush1.bf16.msra.mxu0 %v638_v24  ;;  %p735_p5 = por %p734_p4, %p733_p3 }
  0x45   :  { %671 = vmatpush1.bf16.msra.mxu1 %v670_v25  ;;  %641 = vmatprep.subr.bf16.mxu0 %v640_v26 }
  0x46   :  { %673 = vmatprep.subr.bf16.mxu1 %v672_v29  ;;  %p736_p6 = pnand %p735_p5, %p729_p2 }
  0x48   :  { %643 = vmatpush1.bf16.msra.mxu0 %v642_v32 }
  0x49   :  { %675 = vmatpush1.bf16.msra.mxu1 %v674_v33 }
  0x4b   :  { %248 = vmatmul.mubr.f32.vlgmr.msra.gmra.mrb[0].mxu0 %v111_v34 }
  0x4c   :  { %361 = vmatmul.mubr.f32.vlgmr.msra.gmra.mrb[0].mxu1 %v111_v34  ;;  %253 = vmatprep.mubr.f32.mxu0 %v762_v0 }
  0x4d   :  { %366 = vmatprep.mubr.f32.mxu1 %v762_v0 }
  0x4f   :  { %254 = vmatmul.mubr.f32.gmra.mrb[2].mxu0 %v112_v35 }
  0x50   :  { %367 = vmatmul.mubr.f32.gmra.mrb[2].mxu1 %v112_v35  ;;  %259 = vmatprep.mubr.f32.mxu0 %v762_v0 }
  0x51   :  { %372 = vmatprep.mubr.f32.mxu1 %v762_v0 }
  0x53   :  { %260 = vmatmul.mubr.f32.gmra.mrb[4].mxu0 %v113_v36 }
  0x54   :  { %373 = vmatmul.mubr.f32.gmra.mrb[4].mxu1 %v113_v36  ;;  %265 = vmatprep.mubr.f32.mxu0 %v762_v0 }
  0x55   :  { %378 = vmatprep.mubr.f32.mxu1 %v762_v0 }
  0x57   :  { %266 = vmatmul.mubr.f32.gmra.mrb[6].mxu0 %v114_v37 }
  0x58   :  { %379 = vmatmul.mubr.f32.gmra.mrb[6].mxu1 %v114_v37  ;;  %271 = vmatprep.mubr.f32.mxu0 %v762_v0 }
  0x59   :  { %384 = vmatprep.mubr.f32.mxu1 %v762_v0 }
  0x5b   :  { %272 = vmatmul.mubr.f32.gmra.mrb[8].mxu0 %v115_v38 }
  0x5c   :  { %385 = vmatmul.mubr.f32.gmra.mrb[8].mxu1 %v115_v38  ;;  %277 = vmatprep.mubr.f32.mxu0 %v762_v0 }
  0x5d   :  { %390 = vmatprep.mubr.f32.mxu1 %v762_v0 }
  0x5f   :  { %278 = vmatmul.mubr.f32.gmra.mrb[10].mxu0 %v116_v39 }
  0x60   :  { %391 = vmatmul.mubr.f32.gmra.mrb[10].mxu1 %v116_v39  ;;  %283 = vmatprep.mubr.f32.mxu0 %v762_v0 }
  0x61   :  { %396 = vmatprep.mubr.f32.mxu1 %v762_v0 }
  0x63   :  { %284 = vmatmul.mubr.f32.gmra.mrb[12].mxu0 %v117_v40 }
  0x64   :  { %397 = vmatmul.mubr.f32.gmra.mrb[12].mxu1 %v117_v40  ;;  %289 = vmatprep.mubr.f32.mxu0 %v762_v0 }
  0x65   :  { %402 = vmatprep.mubr.f32.mxu1 %v762_v0 }
  0x67   :  { %290 = vmatmul.mubr.f32.gmra.mrb[14].mxu0 %v118_v41 }
  0x68   :  { %403 = vmatmul.mubr.f32.gmra.mrb[14].mxu1 %v118_v41 }
 0x11e   :  { %v249_v0 = vpop.f32.mrb[0].mxu0 }
 0x11f   :  { %v530_v53 = vadd.f32 %v830_v49, %v249_v0  ;;  %v362_v54 = vpop.f32.mrb[0].mxu1  ;;  %v251_v55 = vpop.f32.mrb[1].mxu0 }
 0x120   :  { %v532_v56 = vadd.f32 %v832_v50, %v362_v54  ;;  %v531_v57 = vadd.f32 %v834_v51, %v251_v55  ;;  %v364_v58 = vpop.f32.mrb[1].mxu1 }
 0x121   :  { %562 = vst [vmem:[#allocation8] sm:$0xff] %v530_v53  ;;  %v533_v59 = vadd.f32 %v836_v52, %v364_v58 }
 0x122   :  { %564 = vst [vmem:[#allocation8 + $0x10] sm:$0xff] %v532_v56  ;;  %563 = vst [vmem:[#allocation8 + $0x8] sm:$0xff] %v531_v57  ;;  %v255_v60 = vpop.f32.mrb[2].mxu0 }
 0x123   :  { %565 = vst [vmem:[#allocation8 + $0x18] sm:$0xff] %v533_v59  ;;  %v534_v61 = vadd.f32 %v830_v49, %v255_v60  ;;  %v368_v62 = vpop.f32.mrb[2].mxu1  ;;  %v257_v63 = vpop.f32.mrb[3].mxu0 }
 0x124   :  { %v536_v1 = vadd.f32 %v832_v50, %v368_v62  ;;  %v535_v2 = vadd.f32 %v834_v51, %v257_v63  ;;  %v370_v3 = vpop.f32.mrb[3].mxu1 }
 0x125   :  { %566 = vst [vmem:[#allocation8 + $0x20] sm:$0xff] %v534_v61  ;;  %v537_v4 = vadd.f32 %v836_v52, %v370_v3 }
 0x126   :  { %568 = vst [vmem:[#allocation8 + $0x30] sm:$0xff] %v536_v1  ;;  %567 = vst [vmem:[#allocation8 + $0x28] sm:$0xff] %v535_v2  ;;  %v261_v5 = vpop.f32.mrb[4].mxu0 }
 0x127   :  { %569 = vst [vmem:[#allocation8 + $0x38] sm:$0xff] %v537_v4  ;;  %v538_v6 = vadd.f32 %v830_v49, %v261_v5  ;;  %v374_v7 = vpop.f32.mrb[4].mxu1  ;;  %v263_v8 = vpop.f32.mrb[5].mxu0 }
 0x128   :  { %v540_v9 = vadd.f32 %v832_v50, %v374_v7  ;;  %v539_v10 = vadd.f32 %v834_v51, %v263_v8  ;;  %v376_v11 = vpop.f32.mrb[5].mxu1 }
 0x129   :  { %570 = vst [vmem:[#allocation8 + $0x40] sm:$0xff] %v538_v6  ;;  %v541_v12 = vadd.f32 %v836_v52, %v376_v11 }
 0x12a   :  { %572 = vst [vmem:[#allocation8 + $0x50] sm:$0xff] %v540_v9  ;;  %571 = vst [vmem:[#allocation8 + $0x48] sm:$0xff] %v539_v10  ;;  %v267_v13 = vpop.f32.mrb[6].mxu0 }
 0x12b   :  { %573 = vst [vmem:[#allocation8 + $0x58] sm:$0xff] %v541_v12  ;;  %v542_v14 = vadd.f32 %v830_v49, %v267_v13  ;;  %v380_v15 = vpop.f32.mrb[6].mxu1  ;;  %v269_v16 = vpop.f32.mrb[7].mxu0 }
 0x12c   :  { %v544_v17 = vadd.f32 %v832_v50, %v380_v15  ;;  %v543_v18 = vadd.f32 %v834_v51, %v269_v16  ;;  %v382_v19 = vpop.f32.mrb[7].mxu1 }
 0x12d   :  { %574 = vst [vmem:[#allocation8 + $0x60] sm:$0xff] %v542_v14  ;;  %v545_v20 = vadd.f32 %v836_v52, %v382_v19 }
 0x12e   :  { %576 = vst [vmem:[#allocation8 + $0x70] sm:$0xff] %v544_v17  ;;  %575 = vst [vmem:[#allocation8 + $0x68] sm:$0xff] %v543_v18  ;;  %v273_v21 = vpop.f32.mrb[8].mxu0 }
 0x12f   :  { %577 = vst [vmem:[#allocation8 + $0x78] sm:$0xff] %v545_v20  ;;  %v546_v22 = vadd.f32 %v830_v49, %v273_v21  ;;  %v386_v23 = vpop.f32.mrb[8].mxu1  ;;  %v275_v24 = vpop.f32.mrb[9].mxu0 }
 0x130   :  { %v548_v25 = vadd.f32 %v832_v50, %v386_v23  ;;  %v547_v26 = vadd.f32 %v834_v51, %v275_v24  ;;  %v388_v27 = vpop.f32.mrb[9].mxu1 }
 0x131   :  { %578 = vst [vmem:[#allocation8 + $0x80] sm:$0xff] %v546_v22  ;;  %v549_v28 = vadd.f32 %v836_v52, %v388_v27 }
 0x132   :  { %580 = vst [vmem:[#allocation8 + $0x90] sm:$0xff] %v548_v25  ;;  %579 = vst [vmem:[#allocation8 + $0x88] sm:$0xff] %v547_v26  ;;  %v279_v29 = vpop.f32.mrb[10].mxu0 }
 0x133   :  { %581 = vst [vmem:[#allocation8 + $0x98] sm:$0xff] %v549_v28  ;;  %v550_v30 = vadd.f32 %v830_v49, %v279_v29  ;;  %v392_v31 = vpop.f32.mrb[10].mxu1  ;;  %v281_v32 = vpop.f32.mrb[11].mxu0 }
 0x134   :  { %v552_v33 = vadd.f32 %v832_v50, %v392_v31  ;;  %v551_v34 = vadd.f32 %v834_v51, %v281_v32  ;;  %v394_v35 = vpop.f32.mrb[11].mxu1 }
 0x135   :  { %582 = vst [vmem:[#allocation8 + $0xa0] sm:$0xff] %v550_v30  ;;  %v553_v36 = vadd.f32 %v836_v52, %v394_v35 }
 0x136   :  { %584 = vst [vmem:[#allocation8 + $0xb0] sm:$0xff] %v552_v33  ;;  %583 = vst [vmem:[#allocation8 + $0xa8] sm:$0xff] %v551_v34  ;;  %v285_v37 = vpop.f32.mrb[12].mxu0 }
 0x137   :  { %585 = vst [vmem:[#allocation8 + $0xb8] sm:$0xff] %v553_v36  ;;  %v554_v38 = vadd.f32 %v830_v49, %v285_v37  ;;  %v398_v39 = vpop.f32.mrb[12].mxu1  ;;  %v287_v40 = vpop.f32.mrb[13].mxu0 }
 0x138   :  { %v556_v41 = vadd.f32 %v832_v50, %v398_v39  ;;  %v555_v42 = vadd.f32 %v834_v51, %v287_v40  ;;  %v400_v43 = vpop.f32.mrb[13].mxu1 }
 0x139   :  { %586 = vst [vmem:[#allocation8 + $0xc0] sm:$0xff] %v554_v38  ;;  %v557_v44 = vadd.f32 %v836_v52, %v400_v43 }
 0x13a   :  { %588 = vst [vmem:[#allocation8 + $0xd0] sm:$0xff] %v556_v41  ;;  %587 = vst [vmem:[#allocation8 + $0xc8] sm:$0xff] %v555_v42  ;;  %v291_v45 = vpop.f32.mrb[14].mxu0 }
 0x13b   :  { %589 = vst [vmem:[#allocation8 + $0xd8] sm:$0xff] %v557_v44  ;;  %v558_v46 = vadd.f32 %v830_v49, %v291_v45  ;;  %v404_v47 = vpop.f32.mrb[14].mxu1  ;;  %v293_v48 = vpop.f32.mrb[15].mxu0 }
 0x13c   :  { %v560_v0 = vadd.f32 %v832_v50, %v404_v47  ;;  %v559_v53 = vadd.f32 %v834_v51, %v293_v48  ;;  %v406_v54 = vpop.f32.mrb[15].mxu1 }
 0x13d   :  { %590 = vst [vmem:[#allocation8 + $0xe0] sm:$0xff] %v558_v46  ;;  %v561_v55 = vadd.f32 %v836_v52, %v406_v54 }
 0x13e   :  { %592 = vst [vmem:[#allocation8 + $0xf0] sm:$0xff] %v560_v0  ;;  %591 = vst [vmem:[#allocation8 + $0xe8] sm:$0xff] %v559_v53 }
 0x13f   :  { %593 = vst [vmem:[#allocation8 + $0xf8] sm:$0xff] %v561_v55 }
 0x140   :  { %739 = shalt.err (!%p736_p6)
}
 0x141   :  { %s740_s17 = scalar_lea.hbm %s888_s3, 4096 }
 0x142   :  { %p741_p7 = scmp.ne.s32.totalorder %s888_s3, %s740_s17  ;;  %p744_p8 = scmp.lt.u32.totalorder %s740_s17, %s888_s3 }
 0x144   :  { %p746_p9 = pnand %p744_p8, %p741_p7 }
 0x146   :  { %749 = shalt.err (!%p746_p9)
}
 0x147   :  { %605 = dma.vmem_to_hbm [thread:$0]  %s600_s13, 4096, %s888_s3, [#allocation5], %s760_s0, %s760_s0, %s761_s9  }
 0x148   :  { %754 = dma.done.wait [#allocation5], 4096  }
 0x149   :  { %755 = vsyncadd [#allocation5], 4294963200 }
 0x14a   :  { %609 = vsyncpa [#allocation4], 1 }
 0x14b   :  { %610 = vsyncpa [#allocation7], 1 }
 0x14c   :  { %611 = vsyncpa [#allocation5], 1 }

</bundles_post_ra>
